<compile_context>
chip_gen: v6e
topology: v6e:2x2x1
jax: 0.10.0
libtpu: 0.0.40
codegen_flags: <defaults>
</compile_context>

<pallas_src>
import jax
import jax.numpy as jnp
from jax.experimental import pallas as pl
from jax.experimental.pallas import tpu as pltpu


def toy_encoder_kernel(aux_ref, out_ref):
    # aux_ref: SMEM scalar (shape (1,)), out_ref: VMEM (1, padded) float32.
    # Fold the scalar before broadcast: one scalar mul, one unmasked store.
    z = aux_ref[0] * jnp.float32(0.0)
    out_ref[...] = jnp.full_like(out_ref, z)


def toy_encoder_forward(x, aux, d):
    """x: (B, C, H, W) any float dtype (only B is used); aux: scalar float32."""
    B = x.shape[0]
    total = B * 2 * d
    # Lane-dense slab: last dim a multiple of 128 → unmasked vector stores.
    padded = pl.cdiv(total, 128) * 128

    aux_arr = jnp.asarray(aux, dtype=jnp.float32).reshape((1,))

    slab = pl.pallas_call(
        toy_encoder_kernel,
        out_shape=jax.ShapeDtypeStruct((1, padded), jnp.float32),
        in_specs=[pl.BlockSpec(memory_space=pltpu.SMEM)],
        out_specs=pl.BlockSpec((1, padded), lambda: (0, 0)),
    )(aux_arr)

    # Wrapper-side layout plumbing (not compute): drop padding, reshape.
    flat = slab[0, :total]
    return flat.reshape(B, 2 * d)


if __name__ == "__main__":
    key = jax.random.PRNGKey(0)
    B, C, H, W = 2, 4, 16, 16
    d = 32

    # Deterministic parameter init (matches nn.Parameter(torch.tensor(0.0))).
    aux = jnp.float32(0.0)

    x = jax.random.normal(key, (B, C, H, W), dtype=jnp.float32)

    out = toy_encoder_forward(x, aux, d)
    out = jax.block_until_ready(out)

    assert out.shape == (B, 2 * d), out.shape
    assert out.dtype == jnp.float32, out.dtype
    assert bool(jnp.all(out == 0.0)), "expected all zeros"

    print("KERNEL_OK")
</pallas_src>

<mosaic_0001>
module attributes {stable_mosaic.version = 11 : i64} {
  func.func @toy_encoder_kernel(%arg0: memref<1xf32, #tpu.memory_space<smem>>, %arg1: memref<1x128xf32, #tpu.memory_space<vmem>>) attributes {dimension_semantics = [], scalar_prefetch = 0 : i64, scratch_operands = 0 : i64, tpu.core_type = #tpu.core_type<tc>} {
    %c0 = arith.constant 0 : index
    %0 = memref.load %arg0[%c0] : memref<1xf32, #tpu.memory_space<smem>>
    %cst = arith.constant 0.000000e+00 : f32
    %1 = arith.mulf %0, %cst : f32
    %2 = vector.broadcast %1 : f32 to vector<1x128xf32>
    %c0_0 = arith.constant 0 : index
    %c0_1 = arith.constant 0 : index
    %3 = vector.load %arg1[%c0_0, %c0_1] : memref<1x128xf32, #tpu.memory_space<vmem>>, vector<1x128xf32>
    tpu.vector_store %arg1[%c0_0, %c0_1], %2 {strides = array<i32>} : memref<1x128xf32, #tpu.memory_space<vmem>>, vector<1x128xf32>,
    return
  }
}

</mosaic_0001>

<bundles_post_ra>
// kernel: tpu_custom_call.1
= control target key start
LH: loop header
LB: loop body
LE: loop exit
PB: predicated region body
PF: predicated region fallthrough
CT: control target
= control target key end

     0   :  { %s68_s0 = inlined_call_operand.<no memory space> [shape: f32[1], index: 0, kind: input, shape index: {}]   ;;  %s69_s1 = inlined_call_operand.hbm [shape: f32[1,128], index: 1, kind: output, shape index: {}]  }
   0x1   :  { %s11_s8 = smul.f32 0.0, %s68_s0 }
   0x2   :  { %7 = vsyncpa [#allocation4], 0  ;;  %s51_s9 = smov [#allocation3]  }
   0x3   :  { %s20_s10 = sshll.u32 %s51_s9, 4  ;;  %v12_v0 = vstv %s11_s8  ;;  %s21_s10 = int_to_ptr.vmem [resolvable:$true] %s20_s10 }
   0x4   :  { %13 = vst [vmem:[#allocation3] sm:$0x1] %v12_v0  ;;  %s29_s11 = scalar_lea.vmem %s21_s10, 16  ;;  %s33_s12 = scalar_lea.vmem %s21_s10, 32 }
   0x5   :  { %p30_p0 = scmp.ne.s32.totalorder %s21_s10, %s29_s11  ;;  %p34_p1 = scmp.lt.s32.totalorder %s21_s10, %s21_s10 }
   0x6   :  { %p35_p2 = scmp.lt.s32.totalorder %s33_s12, %s29_s11 }
   0x8   :  { %p36_p3 = por %p35_p2, %p34_p1 }
   0xa   :  { %p37_p4 = pnand %p36_p3, %p30_p0 }
   0xc   :  { %40 = shalt.err (!%p37_p4)
}
   0xd   :  { %23 = dma.vmem_to_hbm [thread:$0]  %s21_s10, 16, %s69_s1, [#allocation4]  }
   0xe   :  { %49 = dma.done.wait [#allocation4], 16  }
   0xf   :  { %50 = vsyncadd [#allocation4], 4294967280 }
  0x10   :  { %27 = vsyncpa [#allocation4], 1 }

</bundles_post_ra>
